<compile_context>
chip_gen: v7x
topology: tpu7x:2x2x1
jax: 0.10.0
libtpu: 0.0.40
codegen_flags: <defaults>
</compile_context>

<pallas_src>
import functools

import numpy as np
import jax
import jax.numpy as jnp
from jax.experimental import pallas as pl
from jax.experimental.pallas import tpu as pltpu

EPS = 1e-5


def _lane_pad(n):
    return ((n + 127) // 128) * 128


def _pick_bblk(batch):
    """Images per grid step: amortize per-step overhead, but keep >= 2 grid
    steps (pipelining; megacore split on v7x) whenever the batch allows."""
    for d in (2, 1):
        if batch % d == 0 and batch // d >= 2:
            return d
    return batch


def _roll_src(x, off, roll_np):
    """t[..., p] = x[..., (p + off) mod L] via a static lane rotation."""
    lanes = x.shape[-1]
    if off % lanes == 0:
        return x
    shift = (-off) % lanes if roll_np else off % lanes
    return pltpu.roll(x, shift, x.ndim - 1)


# ---------------------------------------------------------------------------
# Pallas kernels
# ---------------------------------------------------------------------------
def _bn_conv_relu(x_ref, m_ref, sc_ref, sh_ref, w_ref, b_ref, col_refs, *,
                  W, roll_np):
    """relu(conv3x3_same(bn(x))) for a block of images.

    x_ref : (bblk, Cin, hwp) f32, pixels flattened row-major over (H, W)
    m_ref : (9, hwp) f32 per-tap validity masks (image border + lane pad)
    w_ref : (Cout, K) bf16 packed conv taps (K = 9*Cin, padded to 16 if Cin=1)
    Returns (Cout, bblk*hwp) f32 with the images concatenated along lanes.
    """
    bblk, cin, hwp = x_ref.shape

    def tap(xbn, k):
        dy, dx = k // 3 - 1, k % 3 - 1
        return _roll_src(xbn, dy * W + dx, roll_np) * m_ref[k:k + 1, :]

    # inference BatchNorm2d folded to a per-channel affine (f32 math)
    xbn = [x_ref[b] * sc_ref[...] + sh_ref[...] for b in range(bblk)]

    if cin == 1:
        # Layer-1 special case: K is tiny, build the whole im2col block as a
        # value (one concat + one mask multiply, no per-row scratch stores).
        cols = []
        for b in range(bblk):
            c9 = jnp.concatenate(
                [_roll_src(xbn[b], (k // 3 - 1) * W + (k % 3 - 1), roll_np)
                 for k in range(9)], axis=0) * m_ref[...]
            c16 = jnp.concatenate(
                [c9, jnp.zeros((7, hwp), jnp.float32)], axis=0)
            cols.append(c16.astype(jnp.bfloat16))
        col = cols[0] if bblk == 1 else jnp.concatenate(cols, axis=1)
        acc = jnp.dot(w_ref[...], col, preferred_element_type=jnp.float32)
    else:
        # 3 groups of 3 taps accumulated through two alternating bf16 buffers
        # so group g+1's roll/mask/store work can overlap group g's matmul.
        acc = None
        for g in range(3):
            buf = col_refs[g % 2]
            for b in range(bblk):
                for j in range(3):
                    buf[j * cin:(j + 1) * cin, b * hwp:(b + 1) * hwp] = (
                        tap(xbn[b], 3 * g + j).astype(jnp.bfloat16))
            part = jnp.dot(w_ref[:, 3 * g * cin:3 * (g + 1) * cin], buf[...],
                           preferred_element_type=jnp.float32)
            acc = part if acc is None else acc + part
    return jnp.maximum(acc + b_ref[...], 0.0)


def _conv_pool_kernel(x_ref, m_ref, sc_ref, sh_ref, w_ref, b_ref, o_ref,
                      *col_refs, W, pool_offs, roll_np):
    """BN2d -> Conv2d(3x3,'same') -> ReLU -> max-pool window max (epilogue)."""
    bblk, _, hwp = x_ref.shape
    y = _bn_conv_relu(x_ref, m_ref, sc_ref, sh_ref, w_ref, b_ref, col_refs,
                      W=W, roll_np=roll_np)
    pm = y
    for off in pool_offs:
        pm = jnp.maximum(pm, _roll_src(y, off, roll_np))
    for b in range(bblk):
        o_ref[b] = pm[:, b * hwp:(b + 1) * hwp]


def _conv_head_kernel(x_ref, m_ref, sc_ref, sh_ref, w_ref, b_ref,
                      w1_ref, b1_ref, w2_ref, b2_ref, o_ref,
                      cola_ref, colb_ref, feat_ref, *, W, roll_np):
    """Block 3 fully fused: BN2d -> conv(64->8) -> ReLU -> MaxPool2d((2,2))
    -> Flatten -> BN1d -> Linear(576,128) -> ReLU -> BN1d -> Linear(128,n).

    The stride-2 pooled-pixel selection, the torch flatten order and both
    BatchNorm1d affines are folded into w1/b1/w2/b2 at init (unselected or
    padded lanes get zero weight columns)."""
    bblk, _, hwp = x_ref.shape
    cout = w_ref.shape[0]
    y = _bn_conv_relu(x_ref, m_ref, sc_ref, sh_ref, w_ref, b_ref,
                      (cola_ref, colb_ref), W=W, roll_np=roll_np)
    pm = y                                          # MaxPool2d((2,2)) window max
    for off in (1, W, W + 1):
        pm = jnp.maximum(pm, _roll_src(y, off, roll_np))
    for b in range(bblk):                           # per-image lane-major flatten
        for c in range(cout):
            feat_ref[b:b + 1, c * hwp:(c + 1) * hwp] = \
                pm[c:c + 1, b * hwp:(b + 1) * hwp]
    h1 = jnp.dot(feat_ref[...].astype(jnp.bfloat16), w1_ref[...],
                 preferred_element_type=jnp.float32) + b1_ref[...]
    h1 = jnp.maximum(h1, 0.0)
    logits = jnp.dot(h1.astype(jnp.bfloat16), w2_ref[...],
                     preferred_element_type=jnp.float32) + b2_ref[...]
    for b in range(bblk):
        o_ref[b] = logits[b:b + 1, :]


# ---------------------------------------------------------------------------
# Wrappers (pallas_call plumbing)
# ---------------------------------------------------------------------------
def conv_block(x, p, *, W, pool_offs, roll_np, bblk):
    """x: (B, Cin, hwp) f32 -> (B, Cout, hwp) f32 max-pool window max."""
    B, cin, hwp = x.shape
    cout, kdim = p['w'].shape
    scratch = []
    if cin > 1:
        scratch = [pltpu.VMEM((3 * cin, bblk * hwp), jnp.bfloat16),
                   pltpu.VMEM((3 * cin, bblk * hwp), jnp.bfloat16)]
    return pl.pallas_call(
        functools.partial(_conv_pool_kernel, W=W, pool_offs=pool_offs,
                          roll_np=roll_np),
        grid=(B // bblk,),
        in_specs=[
            pl.BlockSpec((bblk, cin, hwp), lambda i: (i, 0, 0)),
            pl.BlockSpec((9, hwp), lambda i: (0, 0)),
            pl.BlockSpec((cin, 1), lambda i: (0, 0)),
            pl.BlockSpec((cin, 1), lambda i: (0, 0)),
            pl.BlockSpec((cout, kdim), lambda i: (0, 0)),
            pl.BlockSpec((cout, 1), lambda i: (0, 0)),
        ],
        out_specs=pl.BlockSpec((bblk, cout, hwp), lambda i: (i, 0, 0)),
        out_shape=jax.ShapeDtypeStruct((B, cout, hwp), jnp.float32),
        scratch_shapes=scratch,
        compiler_params=pltpu.CompilerParams(
            dimension_semantics=("parallel",),      # megacore split on v7x
            vmem_limit_bytes=32 * 1024 * 1024),
    )(x, p['mask'], p['sc'], p['sh'], p['w'], p['b'])


def conv_head_block(x, p, hp, *, W, roll_np, bblk):
    """x: (B, 64, hwp) -> head logits (B, n_pad)."""
    B, cin, hwp = x.shape
    cout, kdim = p['w'].shape
    npad = hp['w2'].shape[1]
    out = pl.pallas_call(
        functools.partial(_conv_head_kernel, W=W, roll_np=roll_np),
        grid=(B // bblk,),
        in_specs=[
            pl.BlockSpec((bblk, cin, hwp), lambda i: (i, 0, 0)),
            pl.BlockSpec((9, hwp), lambda i: (0, 0)),
            pl.BlockSpec((cin, 1), lambda i: (0, 0)),
            pl.BlockSpec((cin, 1), lambda i: (0, 0)),
            pl.BlockSpec((cout, kdim), lambda i: (0, 0)),
            pl.BlockSpec((cout, 1), lambda i: (0, 0)),
            pl.BlockSpec(hp['w1'].shape, lambda i: (0, 0)),
            pl.BlockSpec(hp['b1'].shape, lambda i: (0, 0)),
            pl.BlockSpec(hp['w2'].shape, lambda i: (0, 0)),
            pl.BlockSpec(hp['b2'].shape, lambda i: (0, 0)),
        ],
        out_specs=pl.BlockSpec((bblk, 1, npad), lambda i: (i, 0, 0)),
        out_shape=jax.ShapeDtypeStruct((B, 1, npad), jnp.float32),
        scratch_shapes=[
            pltpu.VMEM((3 * cin, bblk * hwp), jnp.bfloat16),
            pltpu.VMEM((3 * cin, bblk * hwp), jnp.bfloat16),
            pltpu.VMEM((bblk, cout * hwp), jnp.float32),
        ],
        compiler_params=pltpu.CompilerParams(
            dimension_semantics=("parallel",),
            vmem_limit_bytes=32 * 1024 * 1024),
    )(x, p['mask'], p['sc'], p['sh'], p['w'], p['b'],
      hp['w1'], hp['b1'], hp['w2'], hp['b2'])
    return out[:, 0, :]


def _detect_roll_semantics():
    """Probe pltpu.roll's rotate convention once; check BOTH candidates."""
    x = jnp.broadcast_to(jnp.arange(128, dtype=jnp.float32), (8, 128))

    def kernel(x_ref, o_ref):
        o_ref[...] = pltpu.roll(x_ref[...], 1, 1)

    out = np.asarray(pl.pallas_call(
        kernel, out_shape=jax.ShapeDtypeStruct((8, 128), jnp.float32))(x)[0])
    base = np.arange(128, dtype=np.float32)
    if np.array_equal(out, np.roll(base, 1)):
        return True                               # numpy / jnp.roll convention
    if np.array_equal(out, np.roll(base, -1)):
        return False
    raise AssertionError("unrecognized pltpu.roll semantics")


def cnn1_forward(x, params, *, roll_np, n_out):
    """Same semantics as CNN1.forward (inference); x: (B, window, channels)."""
    B, H, W = x.shape
    bblk = _pick_bblk(B)

    def to_lanes(h, HW):
        hwp = _lane_pad(HW)
        if hwp > HW:
            h = jnp.pad(h, ((0, 0), (0, 0), (0, hwp - HW)))
        return h

    h = to_lanes(x.reshape(B, 1, H * W).astype(jnp.float32), H * W)

    # block 1: BN -> conv(1->64) -> ReLU  [+ in-kernel MaxPool((4,1)) window max]
    h = conv_block(h, params['c1'], W=W, pool_offs=(W, 2 * W, 3 * W),
                   roll_np=roll_np, bblk=bblk)
    h = h[:, :, :H * W].reshape(B, 64, H // 4, 4, W)[:, :, :, 0, :]  # stride-4 rows
    H //= 4
    h = to_lanes(h.reshape(B, 64, H * W), H * W)

    # block 2: BN -> conv(64->64) -> ReLU  [+ MaxPool((4,1)) window max]
    h = conv_block(h, params['c2'], W=W, pool_offs=(W, 2 * W, 3 * W),
                   roll_np=roll_np, bblk=bblk)
    h = h[:, :, :H * W].reshape(B, 64, H // 4, 4, W)[:, :, :, 0, :]
    H //= 4
    h = to_lanes(h.reshape(B, 64, H * W), H * W)

    # block 3 fused with MaxPool((2,2)) + Flatten + BN1d/Linear/ReLU/BN1d/Linear
    # TODO(synk): BatchNorm uses running statistics (inference mode) and
    # Dropout is identity; training-mode batch stats / dropout RNG not done.
    out = conv_head_block(h, params['c3'], params['head'], W=W,
                          roll_np=roll_np, bblk=bblk)
    return out[:, :n_out]


# ---------------------------------------------------------------------------
# Deterministic synthetic parameters (PyTorch layouts -> kernel layouts)
# ---------------------------------------------------------------------------
def _bn_affine(g, beta, mean, var):
    scale = g / jnp.sqrt(var + EPS)
    return scale, beta - mean * scale


def _tap_masks(H, W, hwp):
    """(9, hwp) f32 masks: 1 where the tap's source pixel is inside the image."""
    hw = H * W
    p = np.arange(hwp)
    i, j = p // W, p % W
    in_img = p < hw
    m = np.zeros((9, hwp), np.float32)
    for k in range(9):
        dy, dx = k // 3 - 1, k % 3 - 1
        ok = in_img & (i + dy >= 0) & (i + dy < H) & (j + dx >= 0) & (j + dx < W)
        m[k] = ok.astype(np.float32)
    return m


def init_params(key, window, nch, number_gesture=49, class_rest=False):
    n_out = number_gesture + int(class_rest)
    H1, H2, H3 = window, window // 4, window // 16
    feat_dim = 8 * (H3 // 2) * (nch // 2)
    assert feat_dim == 576, "input shape must yield the 576-dim flatten"
    conv_defs = [(1, 64, H1), (64, 64, H2), (64, 8, H3)]

    keys = iter(jax.random.split(key, 32))
    nk = lambda: next(keys)
    params, tparams = {}, {}

    for idx, (cin, cout, H) in enumerate(conv_defs, start=1):
        g = 1.0 + 0.1 * jax.random.normal(nk(), (cin,), jnp.float32)
        beta = 0.1 * jax.random.normal(nk(), (cin,), jnp.float32)
        mean = 0.1 * jax.random.normal(nk(), (cin,), jnp.float32)
        var = jax.random.uniform(nk(), (cin,), jnp.float32, 0.5, 1.5)
        w = 0.1 * jax.random.normal(nk(), (cout, cin, 3, 3), jnp.float32)
        b = 0.1 * jax.random.normal(nk(), (cout,), jnp.float32)
        sc, sh = _bn_affine(g, beta, mean, var)

        # torch OIHW -> (Cout, 9*Cin) with column index = tap*Cin + ci
        wst = jnp.transpose(w, (2, 3, 1, 0)).reshape(9 * cin, cout).T
        if cin == 1:
            wst = jnp.pad(wst, ((0, 0), (0, 16 - 9)))     # pad tiny K to 16
        params[f'c{idx}'] = dict(
            sc=sc.reshape(cin, 1), sh=sh.reshape(cin, 1),
            w=wst.astype(jnp.bfloat16), b=b.reshape(cout, 1),
            mask=jnp.asarray(_tap_masks(H, nch, _lane_pad(H * nch))))
        tparams[f'c{idx}'] = dict(g=g, beta=beta, mean=mean, var=var, w=w, b=b)

    # head: BN1d(576) -> Linear(576,128) -> ReLU -> BN1d(128) -> Linear(128,n)
    g1 = 1.0 + 0.1 * jax.random.normal(nk(), (576,), jnp.float32)
    beta1 = 0.1 * jax.random.normal(nk(), (576,), jnp.float32)
    mean1 = 0.1 * jax.random.normal(nk(), (576,), jnp.float32)
    var1 = jax.random.uniform(nk(), (576,), jnp.float32, 0.5, 1.5)
    w1 = 0.05 * jax.random.normal(nk(), (128, 576), jnp.float32)
    b1 = 0.1 * jax.random.normal(nk(), (128,), jnp.float32)
    g2 = 1.0 + 0.1 * jax.random.normal(nk(), (128,), jnp.float32)
    beta2 = 0.1 * jax.random.normal(nk(), (128,), jnp.float32)
    mean2 = 0.1 * jax.random.normal(nk(), (128,), jnp.float32)
    var2 = jax.random.uniform(nk(), (128,), jnp.float32, 0.5, 1.5)
    w2 = 0.05 * jax.random.normal(nk(), (n_out, 128), jnp.float32)
    b2 = 0.1 * jax.random.normal(nk(), (n_out,), jnp.float32)

    sc1, sh1 = _bn_affine(g1, beta1, mean1, var1)
    sc2, sh2 = _bn_affine(g2, beta2, mean2, var2)
    w1f = np.asarray(w1 * sc1[None, :])               # BN1d(576) folded in
    b1f = np.asarray(b1 + w1 @ sh1)
    w2f = np.asarray(w2 * sc2[None, :])               # BN1d(128) folded in
    b2f = np.asarray(b2 + w2 @ sh2)

    # Expand w1f's 576 feature columns onto the conv-3 running-max lane grid:
    # torch-flatten feature (c, h, w) sits at lane 2*h*nch + 2*w of channel
    # c's hwp3-lane map; all other lanes (non-selected / lane padding) get
    # zero columns, which also implements the stride-2 pool selection.
    hp3, wp3 = H3 // 2, nch // 2
    hwp3 = _lane_pad(H3 * nch)
    w1e = np.zeros((8 * hwp3, 128), np.float32)
    for c in range(8):
        for hh in range(hp3):
            for ww in range(wp3):
                f = (c * hp3 + hh) * wp3 + ww
                lane = (2 * hh) * nch + 2 * ww
                w1e[c * hwp3 + lane, :] = w1f[:, f]
    npad = 128                                        # lane-pad the class dim
    w2p = np.zeros((128, npad), np.float32)
    w2p[:, :n_out] = w2f.T
    b2p = np.zeros((npad,), np.float32)
    b2p[:n_out] = b2f

    params['head'] = dict(
        w1=jnp.asarray(w1e, jnp.bfloat16), b1=jnp.asarray(b1f).reshape(1, 128),
        w2=jnp.asarray(w2p, jnp.bfloat16), b2=jnp.asarray(b2p).reshape(1, npad))
    tparams['head'] = dict(g1=g1, beta1=beta1, mean1=mean1, var1=var1, w1=w1,
                           b1=b1, g2=g2, beta2=beta2, mean2=mean2, var2=var2,
                           w2=w2, b2=b2)
    return params, tparams, n_out


# ---------------------------------------------------------------------------
# Pure-JAX reference (torch NCHW semantics) for validation
# ---------------------------------------------------------------------------
def reference_forward(x, tparams):
    B, win, nch = x.shape
    h = x.reshape(B, 1, win, nch)

    def bn2d(h, p):
        s = p['g'] / jnp.sqrt(p['var'] + EPS)
        return (h - p['mean'][None, :, None, None]) * s[None, :, None, None] \
            + p['beta'][None, :, None, None]

    def conv_block_ref(h, p):
        h = bn2d(h, p)
        h = jax.lax.conv_general_dilated(
            h, p['w'], (1, 1), ((1, 1), (1, 1)),
            dimension_numbers=('NCHW', 'OIHW', 'NCHW'),
            precision=jax.lax.Precision.HIGHEST)
        return jnp.maximum(h + p['b'][None, :, None, None], 0.0)

    def pool(h, ph, pw):
        return jax.lax.reduce_window(h, -jnp.inf, jax.lax.max,
                                     (1, 1, ph, pw), (1, 1, ph, pw), 'VALID')

    h = conv_block_ref(h, tparams['c1']); h = pool(h, 4, 1)
    h = conv_block_ref(h, tparams['c2']); h = pool(h, 4, 1)
    h = conv_block_ref(h, tparams['c3']); h = pool(h, 2, 2)
    f = h.reshape(B, -1)                                 # torch CHW flatten
    hp = tparams['head']
    f = (f - hp['mean1']) * (hp['g1'] / jnp.sqrt(hp['var1'] + EPS)) + hp['beta1']
    f = jnp.maximum(jnp.dot(f, hp['w1'].T,
                            precision=jax.lax.Precision.HIGHEST) + hp['b1'], 0.0)
    f = (f - hp['mean2']) * (hp['g2'] / jnp.sqrt(hp['var2'] + EPS)) + hp['beta2']
    return jnp.dot(f, hp['w2'].T,
                   precision=jax.lax.Precision.HIGHEST) + hp['b2']


# ---------------------------------------------------------------------------
if __name__ == "__main__":
    B, WINDOW, NCH = 2, 128, 36   # 8*(128/32)*(36/2) = 576 == the model's Flatten
    key = jax.random.PRNGKey(0)
    kx, kparam = jax.random.split(key)
    x = jax.random.normal(kx, (B, WINDOW, NCH), dtype=jnp.float32)
    params, tparams, n_out = init_params(kparam, WINDOW, NCH)

    roll_np = _detect_roll_semantics()

    fwd = jax.jit(functools.partial(cnn1_forward, roll_np=roll_np, n_out=n_out))
    out = jax.block_until_ready(fwd(x, params))
    assert out.shape == (B, n_out), out.shape

    ref = jax.block_until_ready(reference_forward(x, tparams))
    err = float(jnp.max(jnp.abs(out - ref)) / (jnp.max(jnp.abs(ref)) + 1e-6))
    if not np.isfinite(err) or err > 3e-2:
        raise AssertionError(f"mismatch vs reference: rel-to-max err = {err}")
    print("KERNEL_OK")
</pallas_src>

<mosaic_0001>
module attributes {stable_mosaic.version = 11 : i64} {
  func.func @kernel(%arg0: memref<8x128xf32, #tpu.memory_space<vmem>>, %arg1: memref<8x128xf32, #tpu.memory_space<vmem>>) attributes {dimension_semantics = [], scalar_prefetch = 0 : i64, scratch_operands = 0 : i64, tpu.core_type = #tpu.core_type<tc>} {
    %c0 = arith.constant 0 : index
    %c0_0 = arith.constant 0 : index
    %0 = vector.load %arg0[%c0, %c0_0] : memref<8x128xf32, #tpu.memory_space<vmem>>, vector<8x128xf32>
    %c1_i32 = arith.constant 1 : i32
    %1 = tpu.dynamic_rotate %0 by %c1_i32 dim 1 : vector<8x128xf32>, i32 -> vector<8x128xf32>
    %c0_1 = arith.constant 0 : index
    %c0_2 = arith.constant 0 : index
    %2 = vector.load %arg1[%c0_1, %c0_2] : memref<8x128xf32, #tpu.memory_space<vmem>>, vector<8x128xf32>
    tpu.vector_store %arg1[%c0_1, %c0_2], %1 {strides = array<i32>} : memref<8x128xf32, #tpu.memory_space<vmem>>, vector<8x128xf32>,
    return
  }
}

</mosaic_0001>

<bundles_post_ra>
// kernel: tpu_custom_call.1
= control target key start
LH: loop header
LB: loop body
LE: loop exit
PB: predicated region body
PF: predicated region fallthrough
CT: control target
= control target key end

     0   :  { %6 = vsyncpa [#allocation3], 0  ;;  %s128_s0 = inlined_call_operand.hbm [shape: f32[8,128], index: 0, kind: input, shape index: {}]   ;;  %s129_s1 = inlined_call_operand.hbm [shape: f32[8,128], index: 1, kind: output, shape index: {}]  }
   0x1   :  { %7 = vsyncpa [#allocation4], 0  ;;  %s91_s6 = smov [#allocation2]   ;;  %s43_s10 = scalar_lea.hbm %s128_s0, 128 }
   0x2   :  { %s14_s7 = sshll.u32 %s91_s6, 4  ;;  %p44_p0 = scmp.ne.s32.totalorder %s128_s0, %s43_s10  ;;  %s15_s7 = int_to_ptr.vmem [resolvable:$true] %s14_s7 }
   0x3   :  { %p47_p1 = scmp.lt.u32.totalorder %s43_s10, %s128_s0 }
   0x5   :  { %p49_p2 = pnand %p47_p1, %p44_p0 }
   0x7   :  { %52 = shalt.err (!%p49_p2)
}
   0x8   :  { %s53_s15 = scalar_lea.vmem %s15_s7, 128  ;;  %p58_p4 = scmp.lt.s32.totalorder %s15_s7, %s15_s7 }
   0x9   :  { %p54_p3 = scmp.ne.s32.totalorder %s15_s7, %s53_s15  ;;  %p59_p5 = scmp.lt.s32.totalorder %s53_s15, %s53_s15 }
   0xb   :  { %p60_p6 = por %p59_p5, %p58_p4 }
   0xd   :  { %p61_p7 = pnand %p60_p6, %p54_p3 }
   0xf   :  { %64 = shalt.err (!%p61_p7)
}
  0x10   :  { %17 = dma.hbm_to_vmem [thread:$0]  %s128_s0, 128, %s15_s7, [#allocation3]  }
  0x11   :  { %87 = dma.done.wait [#allocation3], 128  }
  0x12   :  { %88 = vsyncadd [#allocation3], 4294967168  ;;  %v21_v0 = vld [vmem:[#allocation2] sm:$0xff]  ;;  %s92_s18 = smov 1   ;;  %s93_s19 = smov [#allocation5]  }
  0x13   :  { %22 = vrot.lane.b32.xlu0 %v21_v0, %s92_s18  ;;  %s31_s20 = sshll.u32 %s93_s19, 4  ;;  %s32_s20 = int_to_ptr.vmem [resolvable:$true] %s31_s20 }
  0x14   :  { %s65_s21 = scalar_lea.vmem %s32_s20, 128  ;;  %p70_p9 = scmp.lt.s32.totalorder %s32_s20, %s32_s20 }
  0x15   :  { %p66_p8 = scmp.ne.s32.totalorder %s32_s20, %s65_s21  ;;  %p71_p10 = scmp.lt.s32.totalorder %s65_s21, %s65_s21 }
  0x17   :  { %p72_p11 = por %p71_p10, %p70_p9 }
  0x19   :  { %p73_p12 = pnand %p72_p11, %p66_p8 }
  0x85   :  { %v23_v1 = vpop.permute.xlu0 %22 }
  0x86   :  { %24 = vst [vmem:[#allocation5] sm:$0xff] %v23_v1 }
  0x87   :  { %76 = shalt.err (!%p73_p12)
}
  0x88   :  { %s77_s0 = scalar_lea.hbm %s129_s1, 128 }
  0x89   :  { %p78_p13 = scmp.ne.s32.totalorder %s129_s1, %s77_s0  ;;  %p81_p0 = scmp.lt.u32.totalorder %s77_s0, %s129_s1 }
  0x8b   :  { %p83_p1 = pnand %p81_p0, %p78_p13 }
  0x8d   :  { %86 = shalt.err (!%p83_p1)
}
  0x8e   :  { %34 = dma.vmem_to_hbm [thread:$0]  %s32_s20, 128, %s129_s1, [#allocation4]  }
  0x8f   :  { %89 = dma.done.wait [#allocation4], 128  }
  0x90   :  { %90 = vsyncadd [#allocation4], 4294967168 }
  0x91   :  { %38 = vsyncpa [#allocation3], 1 }
  0x92   :  { %39 = vsyncpa [#allocation4], 1 }

</bundles_post_ra>
